<compile_context>
chip_gen: v6e
topology: v6e:2x2x1
jax: 0.10.0
libtpu: 0.0.40
codegen_flags: <defaults>
</compile_context>

<pallas_src>
import functools

import jax
import jax.numpy as jnp
from jax.experimental import pallas as pl
from jax.experimental.pallas import tpu as pltpu


def _sublane_tile_rows(dtype):
    # Rows per native sublane tile: 8 for 32-bit, 16 for 16-bit (packed) dtypes.
    return 8 * (4 // jnp.dtype(dtype).itemsize)


# ----------------------------- Pallas kernel --------------------------------
def upsample1d_kernel(x_ref, wm_ref, sb_ref, o_ref, *,
                      batch_block, phase_offsets, c_in, t_out,
                      deep_contraction, inv_l, eps, neg_slope):
    """Fused polyphase ConvTranspose1d + InstanceNorm + AdaIN affine + LeakyReLU.

    x_ref  : (Bt, C_in, T_pad)   halo-padded input (compute dtype)
    wm_ref : (S, C_out, NC)      weight-normed polyphase weights, NC = n_max*C_in
    sb_ref : (Bt, 2, C_out, 1)   [*, 0] = 1+gamma, [*, 1] = beta  (f32)
    o_ref  : (Bt, S, C_out, T)   phase-major f32 output (also the conv accumulator)
    """
    num_phases = len(phase_offsets)
    c_out = o_ref.shape[2]

    for bi in range(batch_block):
        # ---- transposed conv (polyphase) + single-pass stats ----------------
        ssum = jnp.zeros((c_out, 1), jnp.float32)
        ssq = jnp.zeros((c_out, 1), jnp.float32)
        for phi in range(num_phases):
            offs = phase_offsets[phi]
            if deep_contraction:
                # One deep MXU matmul per phase (preferred on v5e/v6e — single
                # push/pop chain).  The shifted-slice slab lives only in VMEM.
                slab = jnp.concatenate(
                    [x_ref[bi, :, off:off + t_out] for off in offs], axis=0)
                r = jnp.dot(wm_ref[phi], slab,
                            preferred_element_type=jnp.float32)
            else:
                # Per-tap accumulation (v7x MRB-friendly; avoids the concat).
                r = jnp.dot(wm_ref[phi, :, 0:c_in],
                            x_ref[bi, :, offs[0]:offs[0] + t_out],
                            preferred_element_type=jnp.float32)
                for j in range(1, len(offs)):
                    r = r + jnp.dot(
                        wm_ref[phi, :, j * c_in:(j + 1) * c_in],
                        x_ref[bi, :, offs[j]:offs[j] + t_out],
                        preferred_element_type=jnp.float32)

            o_ref[bi, phi] = r                      # conv result straight to output
            ssum = ssum + jnp.sum(r, axis=-1, keepdims=True)
            ssq = ssq + jnp.sum(r * r, axis=-1, keepdims=True)

        # ---- InstanceNorm stats + AdaIN affine folded into one scale/shift --
        mean = ssum * inv_l                                     # (C_out, 1)
        var = jnp.maximum(ssq * inv_l - mean * mean, 0.0)       # clamp single-pass var
        rstd = jax.lax.rsqrt(var + eps)
        a = sb_ref[bi, 0] * rstd                                # (1+gamma) * rstd
        b = sb_ref[bi, 1] - mean * a                            # beta - mean*a

        # ---- per-phase fused scale/shift + LeakyReLU (bounded live ranges) --
        for phi in range(num_phases):
            y = o_ref[bi, phi] * a + b
            o_ref[bi, phi] = jnp.where(y > 0, y, neg_slope * y)


# ----------------------------- wrapper ---------------------------------------
def upsample1d_forward(x, s, params, *, kernel_size, stride,
                       batch_block=1, compute_dtype=jnp.float32,
                       deep_contraction=None, interleave=True,
                       eps=1e-5, neg_slope=0.01):
    """x: (B, C_in, T) f32, s: (B, style_dim) f32 -> (B, C_out, T*stride) f32."""
    v, g, fc_w, fc_b = params["v"], params["g"], params["fc_w"], params["fc_b"]
    # NOTE: params["conv_b"] is intentionally unused — a per-channel bias added
    # before InstanceNorm(affine=False) cancels exactly when the mean is subtracted.

    B, C_in, T = x.shape
    C_out = v.shape[1]
    K, S = kernel_size, stride
    assert S <= K and (K - S) % 2 == 0, \
        "pad math requires stride <= kernel_size and (kernel_size - stride) even"
    pad = (K - S) // 2
    L_out = (T - 1) * S - 2 * pad + K
    assert L_out == T * S
    assert B % batch_block == 0

    # ---- weight_norm (dim=0): w = g * v / ||v||_{dims (1,2)} ----
    norm = jnp.sqrt(jnp.sum(v * v, axis=(1, 2), keepdims=True))
    w = (g * v / norm).astype(jnp.float32)                       # (C_in, C_out, K)

    # ---- polyphase tap bookkeeping (static Python) ----
    # out[q*S + phi] = sum_{k : (phi + pad - k) % S == 0} w[:, :, k]^T @ x[:, q + d],
    #                  with d = (phi + pad - k) // S  (out-of-range q+d contributes 0)
    phase_taps, all_d = [], []
    for phi in range(S):
        taps = [(k, (phi + pad - k) // S)
                for k in range(K) if (phi + pad - k) % S == 0]
        phase_taps.append(taps)
        all_d += [d for _, d in taps]
    n_max = max(len(t) for t in phase_taps)
    pad_l = max(0, -min(all_d))
    pad_r = max(0, max(all_d))
    NC = n_max * C_in
    T_pad = T + pad_l + pad_r

    # ---- halo-padded input (this is the ONLY x-sized HBM buffer the kernel reads)
    x_pad = jnp.pad(x.astype(compute_dtype), ((0, 0), (0, 0), (pad_l, pad_r)))

    # ---- polyphase weights (S, C_out, NC) + static per-phase slice offsets ----
    wm = jnp.zeros((S, C_out, NC), dtype=jnp.float32)
    phase_offsets = []
    for phi, taps in enumerate(phase_taps):
        offs = []
        for j, (k, d) in enumerate(taps):
            wm = wm.at[phi, :, j * C_in:(j + 1) * C_in].set(w[:, :, k].T)
            offs.append(pad_l + d)
        while len(offs) < n_max:                 # pad phases (weights stay zero)
            offs.append(pad_l)
        phase_offsets.append(tuple(offs))
    phase_offsets = tuple(phase_offsets)
    wm = wm.astype(compute_dtype)

    # Deep-contraction concat needs tap chunks aligned to the sublane tile;
    # otherwise fall back to per-tap matmul accumulation.
    if deep_contraction is None:
        deep_contraction = (C_in % _sublane_tile_rows(compute_dtype) == 0)

    # ---- AdaIN style FC hoisted out of the kernel (one XLA matmul) ----
    h = s.astype(jnp.float32) @ fc_w.T.astype(jnp.float32) + fc_b.astype(jnp.float32)
    sb = jnp.stack([1.0 + h[:, :C_out], h[:, C_out:]], axis=1)   # (B, 2, C_out)
    sb = sb.reshape(B, 2, C_out, 1).astype(jnp.float32)

    # ---- explicit VMEM budget (double-buffered blocks + headroom, v7x-safe) ----
    itemsize = jnp.dtype(compute_dtype).itemsize
    block_bytes = (batch_block * C_in * T_pad * itemsize         # x block
                   + S * C_out * NC * itemsize                   # weights
                   + batch_block * 2 * C_out * 4                 # scale/beta
                   + batch_block * S * C_out * T * 4)            # output block
    vmem_limit = int(min(max(4 * block_bytes, 32 << 20), 48 << 20))

    kern = functools.partial(
        upsample1d_kernel, batch_block=batch_block, phase_offsets=phase_offsets,
        c_in=C_in, t_out=T, deep_contraction=bool(deep_contraction),
        inv_l=1.0 / float(L_out), eps=eps, neg_slope=neg_slope)

    out_phases = pl.pallas_call(
        kern,
        out_shape=jax.ShapeDtypeStruct((B, S, C_out, T), jnp.float32),
        grid_spec=pltpu.PrefetchScalarGridSpec(
            num_scalar_prefetch=0,
            grid=(B // batch_block,),
            in_specs=[
                pl.BlockSpec((batch_block, C_in, T_pad), lambda b: (b, 0, 0)),
                pl.BlockSpec((S, C_out, NC), lambda b: (0, 0, 0)),
                pl.BlockSpec((batch_block, 2, C_out, 1), lambda b: (b, 0, 0, 0)),
            ],
            out_specs=pl.BlockSpec((batch_block, S, C_out, T),
                                   lambda b: (b, 0, 0, 0)),
        ),
        compiler_params=pltpu.CompilerParams(
            dimension_semantics=("parallel",),
            vmem_limit_bytes=vmem_limit),
    )(x_pad, wm, sb)

    if not interleave:
        return out_phases                      # phase-major (B, S, C_out, T)

    # interleave phases: out[b, c, q*S + phi] = out_phases[b, phi, c, q]
    return jnp.transpose(out_phases, (0, 2, 3, 1)).reshape(B, C_out, L_out)


# ----------------------------- pure-JAX reference ----------------------------
def reference_forward(x, s, params, *, kernel_size, stride):
    v, g, conv_b, fc_w, fc_b = (params["v"], params["g"], params["conv_b"],
                                params["fc_w"], params["fc_b"])
    B, C_in, T = x.shape
    C_out = v.shape[1]
    K = kernel_size
    pad = (kernel_size - stride) // 2
    L_out = (T - 1) * stride - 2 * pad + K

    norm = jnp.sqrt(jnp.sum(v * v, axis=(1, 2), keepdims=True))
    w = g * v / norm                                             # (C_in, C_out, K)

    # direct ConvTranspose1d definition: out[t_in*stride + k] += x[t_in] * w[:,:,k]
    buf = jnp.zeros((B, C_out, (T - 1) * stride + K), dtype=jnp.float32)
    for k in range(K):
        contrib = jnp.einsum("bit,io->bot", x, w[:, :, k])
        buf = buf.at[:, :, k:k + (T - 1) * stride + 1:stride].add(contrib)
    y = buf[:, :, pad:pad + L_out] + conv_b[None, :, None]

    # InstanceNorm1d (biased var, eps=1e-5)
    mean = jnp.mean(y, axis=2, keepdims=True)
    var = jnp.mean((y - mean) ** 2, axis=2, keepdims=True)
    yn = (y - mean) / jnp.sqrt(var + 1e-5)

    h = s @ fc_w.T + fc_b                                        # (B, 2*C_out)
    gamma = h[:, :C_out][:, :, None]
    beta = h[:, C_out:][:, :, None]
    out = (1.0 + gamma) * yn + beta
    return jnp.where(out > 0, out, 0.01 * out)


# ----------------------------- main ------------------------------------------
if __name__ == "__main__":
    B, C_in, C_out, T = 2, 16, 16, 32
    kernel_size, stride, style_dim = 4, 2, 64

    key = jax.random.PRNGKey(0)
    k1, k2, k3, k4, k5, k6, k7 = jax.random.split(key, 7)

    x = jax.random.normal(k1, (B, C_in, T), dtype=jnp.float32)
    s = jax.random.normal(k2, (B, style_dim), dtype=jnp.float32)

    params = {
        # ConvTranspose1d weight_norm parameters: v (C_in, C_out, K), g (C_in,1,1)
        "v": jax.random.normal(k3, (C_in, C_out, kernel_size), jnp.float32) * 0.1,
        "g": jax.random.normal(k4, (C_in, 1, 1), jnp.float32) * 0.5 + 1.0,
        "conv_b": jax.random.normal(k5, (C_out,), jnp.float32) * 0.1,
        # AdaIN fc: Linear(style_dim, 2*C_out)
        "fc_w": jax.random.normal(k6, (2 * C_out, style_dim), jnp.float32) * 0.05,
        "fc_b": jax.random.normal(k7, (2 * C_out,), jnp.float32) * 0.1,
    }

    ref = reference_forward(x, s, params, kernel_size=kernel_size, stride=stride)

    # default: batch_block=1 -> grid=(B,), pipelined, deep-contraction matmul
    out = upsample1d_forward(x, s, params, kernel_size=kernel_size, stride=stride)
    out = jax.block_until_ready(out)
    assert out.shape == (B, C_out, T * stride)
    assert jnp.allclose(out, ref, atol=1e-4, rtol=1e-4), \
        f"max err {jnp.max(jnp.abs(out - ref))}"

    # whole batch in a single grid step (exercises the multi-element block path)
    out_bb = upsample1d_forward(x, s, params, kernel_size=kernel_size,
                                stride=stride, batch_block=B)
    out_bb = jax.block_until_ready(out_bb)
    assert jnp.allclose(out_bb, ref, atol=1e-4, rtol=1e-4), \
        f"max err {jnp.max(jnp.abs(out_bb - ref))}"

    # per-tap accumulation variant (v7x MRB-friendly path)
    out_tap = upsample1d_forward(x, s, params, kernel_size=kernel_size,
                                 stride=stride, deep_contraction=False)
    out_tap = jax.block_until_ready(out_tap)
    assert jnp.allclose(out_tap, ref, atol=1e-4, rtol=1e-4), \
        f"max err {jnp.max(jnp.abs(out_tap - ref))}"

    # bf16 matmul inputs, f32 accumulation / stats / affine (looser tolerance)
    out_bf16 = upsample1d_forward(x, s, params, kernel_size=kernel_size,
                                  stride=stride, compute_dtype=jnp.bfloat16)
    out_bf16 = jax.block_until_ready(out_bf16)
    assert jnp.allclose(out_bf16, ref, atol=5e-2, rtol=5e-2), \
        f"max err {jnp.max(jnp.abs(out_bf16 - ref))}"

    print("KERNEL_OK")
</pallas_src>

<mosaic_0001>
module attributes {stable_mosaic.version = 11 : i64} {
  func.func @upsample1d_kernel(%arg0: i32, %arg1: memref<1x16x34xf32, #tpu.memory_space<vmem>>, %arg2: memref<2x16x32xf32, #tpu.memory_space<vmem>>, %arg3: memref<1x2x16x1xf32, #tpu.memory_space<vmem>>, %arg4: memref<1x2x16x32xf32, #tpu.memory_space<vmem>>) attributes {dimension_semantics = [#tpu.dimension_semantics<parallel>], iteration_bounds = array<i64: 2>, scalar_prefetch = 0 : i64, scratch_operands = 0 : i64, tpu.core_type = #tpu.core_type<tc>, window_params = [{transform_indices = @transform_0, window_bounds = array<i64: 1, 16, 34>}, {pipeline_mode = #tpu.pipeline_mode<synchronous>, transform_indices = @transform_1, window_bounds = array<i64: 2, 16, 32>}, {transform_indices = @transform_2, window_bounds = array<i64: 1, 2, 16, 1>}, {transform_indices = @transform_3, window_bounds = array<i64: 1, 2, 16, 32>}]} {
    %cst = arith.constant 0.000000e+00 : f32
    %0 = vector.broadcast %cst : f32 to vector<16x1xf32>
    %cst_0 = arith.constant 0.000000e+00 : f32
    %1 = vector.broadcast %cst_0 : f32 to vector<16x1xf32>
    %c0 = arith.constant 0 : index
    %c0_1 = arith.constant 0 : index
    %c1 = arith.constant 1 : index
    %2 = vector.load %arg1[%c0, %c0_1, %c1] : memref<1x16x34xf32, #tpu.memory_space<vmem>>, vector<1x16x32xf32>
    %3 = vector.shape_cast %2 : vector<1x16x32xf32> to vector<16x32xf32>
    %c0_2 = arith.constant 0 : index
    %c0_3 = arith.constant 0 : index
    %c0_4 = arith.constant 0 : index
    %4 = vector.load %arg1[%c0_2, %c0_3, %c0_4] : memref<1x16x34xf32, #tpu.memory_space<vmem>>, vector<1x16x32xf32>
    %5 = vector.shape_cast %4 : vector<1x16x32xf32> to vector<16x32xf32>
    %6 = tpu.concatenate %3, %5 in 0 : vector<16x32xf32>, vector<16x32xf32> -> vector<32x32xf32>
    %c0_5 = arith.constant 0 : index
    %c0_6 = arith.constant 0 : index
    %c0_7 = arith.constant 0 : index
    %7 = vector.load %arg2[%c0_5, %c0_6, %c0_7] : memref<2x16x32xf32, #tpu.memory_space<vmem>>, vector<1x16x32xf32>
    %8 = vector.shape_cast %7 : vector<1x16x32xf32> to vector<16x32xf32>
    %cst_8 = arith.constant dense<0.000000e+00> : vector<16x32xf32>
    %9 = tpu.matmul %8, %6, %cst_8 {dimension_numbers = #tpu.dot_dimension_numbers<[1], [0], [0], [1], [0, 0, 1, 1], [], []>} : vector<16x32xf32>, vector<32x32xf32>, vector<16x32xf32> -> vector<16x32xf32>
    %c0_9 = arith.constant 0 : index
    %c0_10 = arith.constant 0 : index
    %c0_11 = arith.constant 0 : index
    %c0_12 = arith.constant 0 : index
    %10 = vector.load %arg4[%c0_9, %c0_10, %c0_11, %c0_12] : memref<1x2x16x32xf32, #tpu.memory_space<vmem>>, vector<1x1x16x32xf32>
    %11 = vector.shape_cast %10 : vector<1x1x16x32xf32> to vector<16x32xf32>
    %12 = vector.shape_cast %9 : vector<16x32xf32> to vector<1x1x16x32xf32>
    tpu.vector_store %arg4[%c0_9, %c0_10, %c0_11, %c0_12], %12 {strides = array<i32>} : memref<1x2x16x32xf32, #tpu.memory_space<vmem>>, vector<1x1x16x32xf32>,
    %cst_13 = arith.constant dense<0.000000e+00> : vector<16xf32>
    %13 = vector.multi_reduction <add>, %9, %cst_13 [1] : vector<16x32xf32> to vector<16xf32>
    %14 = vector.shape_cast %13 : vector<16xf32> to vector<16x1xf32>
    %15 = arith.addf %0, %14 : vector<16x1xf32>
    %16 = arith.mulf %9, %9 : vector<16x32xf32>
    %cst_14 = arith.constant dense<0.000000e+00> : vector<16xf32>
    %17 = vector.multi_reduction <add>, %16, %cst_14 [1] : vector<16x32xf32> to vector<16xf32>
    %18 = vector.shape_cast %17 : vector<16xf32> to vector<16x1xf32>
    %19 = arith.addf %1, %18 : vector<16x1xf32>
    %c0_15 = arith.constant 0 : index
    %c0_16 = arith.constant 0 : index
    %c2 = arith.constant 2 : index
    %20 = vector.load %arg1[%c0_15, %c0_16, %c2] : memref<1x16x34xf32, #tpu.memory_space<vmem>>, vector<1x16x32xf32>
    %21 = vector.shape_cast %20 : vector<1x16x32xf32> to vector<16x32xf32>
    %c0_17 = arith.constant 0 : index
    %c0_18 = arith.constant 0 : index
    %c1_19 = arith.constant 1 : index
    %22 = vector.load %arg1[%c0_17, %c0_18, %c1_19] : memref<1x16x34xf32, #tpu.memory_space<vmem>>, vector<1x16x32xf32>
    %23 = vector.shape_cast %22 : vector<1x16x32xf32> to vector<16x32xf32>
    %24 = tpu.concatenate %21, %23 in 0 : vector<16x32xf32>, vector<16x32xf32> -> vector<32x32xf32>
    %c1_20 = arith.constant 1 : index
    %c0_21 = arith.constant 0 : index
    %c0_22 = arith.constant 0 : index
    %25 = vector.load %arg2[%c1_20, %c0_21, %c0_22] : memref<2x16x32xf32, #tpu.memory_space<vmem>>, vector<1x16x32xf32>
    %26 = vector.shape_cast %25 : vector<1x16x32xf32> to vector<16x32xf32>
    %cst_23 = arith.constant dense<0.000000e+00> : vector<16x32xf32>
    %27 = tpu.matmul %26, %24, %cst_23 {dimension_numbers = #tpu.dot_dimension_numbers<[1], [0], [0], [1], [0, 0, 1, 1], [], []>} : vector<16x32xf32>, vector<32x32xf32>, vector<16x32xf32> -> vector<16x32xf32>
    %c0_24 = arith.constant 0 : index
    %c1_25 = arith.constant 1 : index
    %c0_26 = arith.constant 0 : index
    %c0_27 = arith.constant 0 : index
    %28 = vector.load %arg4[%c0_24, %c1_25, %c0_26, %c0_27] : memref<1x2x16x32xf32, #tpu.memory_space<vmem>>, vector<1x1x16x32xf32>
    %29 = vector.shape_cast %28 : vector<1x1x16x32xf32> to vector<16x32xf32>
    %30 = vector.shape_cast %27 : vector<16x32xf32> to vector<1x1x16x32xf32>
    tpu.vector_store %arg4[%c0_24, %c1_25, %c0_26, %c0_27], %30 {strides = array<i32>} : memref<1x2x16x32xf32, #tpu.memory_space<vmem>>, vector<1x1x16x32xf32>,
    %cst_28 = arith.constant dense<0.000000e+00> : vector<16xf32>
    %31 = vector.multi_reduction <add>, %27, %cst_28 [1] : vector<16x32xf32> to vector<16xf32>
    %32 = vector.shape_cast %31 : vector<16xf32> to vector<16x1xf32>
    %33 = arith.addf %15, %32 : vector<16x1xf32>
    %34 = arith.mulf %27, %27 : vector<16x32xf32>
    %cst_29 = arith.constant dense<0.000000e+00> : vector<16xf32>
    %35 = vector.multi_reduction <add>, %34, %cst_29 [1] : vector<16x32xf32> to vector<16xf32>
    %36 = vector.shape_cast %35 : vector<16xf32> to vector<16x1xf32>
    %37 = arith.addf %19, %36 : vector<16x1xf32>
    %cst_30 = arith.constant 1.562500e-02 : f32
    %38 = vector.broadcast %cst_30 : f32 to vector<16x1xf32>
    %39 = arith.mulf %33, %38 : vector<16x1xf32>
    %cst_31 = arith.constant 1.562500e-02 : f32
    %40 = vector.broadcast %cst_31 : f32 to vector<16x1xf32>
    %41 = arith.mulf %37, %40 : vector<16x1xf32>
    %42 = arith.mulf %39, %39 : vector<16x1xf32>
    %43 = arith.subf %41, %42 : vector<16x1xf32>
    %cst_32 = arith.constant 0.000000e+00 : f32
    %44 = vector.broadcast %cst_32 : f32 to vector<16x1xf32>
    %45 = arith.maximumf %43, %44 : vector<16x1xf32>
    %cst_33 = arith.constant 9.99999974E-6 : f32
    %46 = vector.broadcast %cst_33 : f32 to vector<16x1xf32>
    %47 = arith.addf %45, %46 : vector<16x1xf32>
    %48 = math.rsqrt %47 : vector<16x1xf32>
    %c0_34 = arith.constant 0 : index
    %c0_35 = arith.constant 0 : index
    %c0_36 = arith.constant 0 : index
    %c0_37 = arith.constant 0 : index
    %49 = vector.load %arg3[%c0_34, %c0_35, %c0_36, %c0_37] : memref<1x2x16x1xf32, #tpu.memory_space<vmem>>, vector<1x1x16x1xf32>
    %50 = vector.shape_cast %49 : vector<1x1x16x1xf32> to vector<16x1xf32>
    %51 = arith.mulf %50, %48 : vector<16x1xf32>
    %c0_38 = arith.constant 0 : index
    %c1_39 = arith.constant 1 : index
    %c0_40 = arith.constant 0 : index
    %c0_41 = arith.constant 0 : index
    %52 = vector.load %arg3[%c0_38, %c1_39, %c0_40, %c0_41] : memref<1x2x16x1xf32, #tpu.memory_space<vmem>>, vector<1x1x16x1xf32>
    %53 = vector.shape_cast %52 : vector<1x1x16x1xf32> to vector<16x1xf32>
    %54 = arith.mulf %39, %51 : vector<16x1xf32>
    %55 = arith.subf %53, %54 : vector<16x1xf32>
    %c0_42 = arith.constant 0 : index
    %c0_43 = arith.constant 0 : index
    %c0_44 = arith.constant 0 : index
    %c0_45 = arith.constant 0 : index
    %56 = vector.load %arg4[%c0_42, %c0_43, %c0_44, %c0_45] : memref<1x2x16x32xf32, #tpu.memory_space<vmem>>, vector<1x1x16x32xf32>
    %57 = vector.shape_cast %56 : vector<1x1x16x32xf32> to vector<16x32xf32>
    %58 = vector.broadcast %51 : vector<16x1xf32> to vector<16x32xf32>
    %59 = arith.mulf %57, %58 : vector<16x32xf32>
    %60 = vector.broadcast %55 : vector<16x1xf32> to vector<16x32xf32>
    %61 = arith.addf %59, %60 : vector<16x32xf32>
    %cst_46 = arith.constant 0.000000e+00 : f32
    %62 = vector.broadcast %cst_46 : f32 to vector<16x32xf32>
    %63 = arith.cmpf ogt, %61, %62 : vector<16x32xf32>
    %cst_47 = arith.constant 0.00999999977 : f32
    %64 = vector.broadcast %cst_47 : f32 to vector<16x32xf32>
    %65 = arith.mulf %64, %61 : vector<16x32xf32>
    %66 = arith.select %63, %61, %65 : vector<16x32xi1>, vector<16x32xf32>
    %c0_48 = arith.constant 0 : index
    %c0_49 = arith.constant 0 : index
    %c0_50 = arith.constant 0 : index
    %c0_51 = arith.constant 0 : index
    %67 = vector.load %arg4[%c0_48, %c0_49, %c0_50, %c0_51] : memref<1x2x16x32xf32, #tpu.memory_space<vmem>>, vector<1x1x16x32xf32>
    %68 = vector.shape_cast %67 : vector<1x1x16x32xf32> to vector<16x32xf32>
    %69 = vector.shape_cast %66 : vector<16x32xf32> to vector<1x1x16x32xf32>
    tpu.vector_store %arg4[%c0_48, %c0_49, %c0_50, %c0_51], %69 {strides = array<i32>} : memref<1x2x16x32xf32, #tpu.memory_space<vmem>>, vector<1x1x16x32xf32>,
    %c0_52 = arith.constant 0 : index
    %c1_53 = arith.constant 1 : index
    %c0_54 = arith.constant 0 : index
    %c0_55 = arith.constant 0 : index
    %70 = vector.load %arg4[%c0_52, %c1_53, %c0_54, %c0_55] : memref<1x2x16x32xf32, #tpu.memory_space<vmem>>, vector<1x1x16x32xf32>
    %71 = vector.shape_cast %70 : vector<1x1x16x32xf32> to vector<16x32xf32>
    %72 = vector.broadcast %51 : vector<16x1xf32> to vector<16x32xf32>
    %73 = arith.mulf %71, %72 : vector<16x32xf32>
    %74 = vector.broadcast %55 : vector<16x1xf32> to vector<16x32xf32>
    %75 = arith.addf %73, %74 : vector<16x32xf32>
    %cst_56 = arith.constant 0.000000e+00 : f32
    %76 = vector.broadcast %cst_56 : f32 to vector<16x32xf32>
    %77 = arith.cmpf ogt, %75, %76 : vector<16x32xf32>
    %cst_57 = arith.constant 0.00999999977 : f32
    %78 = vector.broadcast %cst_57 : f32 to vector<16x32xf32>
    %79 = arith.mulf %78, %75 : vector<16x32xf32>
    %80 = arith.select %77, %75, %79 : vector<16x32xi1>, vector<16x32xf32>
    %c0_58 = arith.constant 0 : index
    %c1_59 = arith.constant 1 : index
    %c0_60 = arith.constant 0 : index
    %c0_61 = arith.constant 0 : index
    %81 = vector.load %arg4[%c0_58, %c1_59, %c0_60, %c0_61] : memref<1x2x16x32xf32, #tpu.memory_space<vmem>>, vector<1x1x16x32xf32>
    %82 = vector.shape_cast %81 : vector<1x1x16x32xf32> to vector<16x32xf32>
    %83 = vector.shape_cast %80 : vector<16x32xf32> to vector<1x1x16x32xf32>
    tpu.vector_store %arg4[%c0_58, %c1_59, %c0_60, %c0_61], %83 {strides = array<i32>} : memref<1x2x16x32xf32, #tpu.memory_space<vmem>>, vector<1x1x16x32xf32>,
    return
  }
  func.func @transform_0(%arg0: i32) -> (i32, i32, i32) {
    %c0_i32 = arith.constant 0 : i32
    %c0_i32_0 = arith.constant 0 : i32
    %c0_i32_1 = arith.constant 0 : i32
    return %arg0, %c0_i32, %c0_i32_0 : i32, i32, i32
  }
  func.func @transform_1(%arg0: i32) -> (i32, i32, i32) {
    %c0_i32 = arith.constant 0 : i32
    %c0_i32_0 = arith.constant 0 : i32
    %c0_i32_1 = arith.constant 0 : i32
    %c0_i32_2 = arith.constant 0 : i32
    return %c0_i32, %c0_i32_0, %c0_i32_1 : i32, i32, i32
  }
  func.func @transform_2(%arg0: i32) -> (i32, i32, i32, i32) {
    %c0_i32 = arith.constant 0 : i32
    %c0_i32_0 = arith.constant 0 : i32
    %c0_i32_1 = arith.constant 0 : i32
    %c0_i32_2 = arith.constant 0 : i32
    return %arg0, %c0_i32, %c0_i32_0, %c0_i32_1 : i32, i32, i32, i32
  }
  func.func @transform_3(%arg0: i32) -> (i32, i32, i32, i32) {
    %c0_i32 = arith.constant 0 : i32
    %c0_i32_0 = arith.constant 0 : i32
    %c0_i32_1 = arith.constant 0 : i32
    %c0_i32_2 = arith.constant 0 : i32
    return %arg0, %c0_i32, %c0_i32_0, %c0_i32_1 : i32, i32, i32, i32
  }
}

</mosaic_0001>

<bundles_post_ra>
// kernel: tpu_custom_call.1
= control target key start
LH: loop header
LB: loop body
LE: loop exit
PB: predicated region body
PF: predicated region fallthrough
CT: control target
= control target key end

     0   :  { %8 = vsyncpa [#allocation3], 0  ;;  %s964_s0 = inlined_call_operand.vmem [shape: f32[2,16,34], index: 0, kind: input, shape index: {}]   ;;  %s965_s1 = inlined_call_operand.vmem [shape: f32[2,16,32], index: 1, kind: input, shape index: {}]   ;;  %s966_s2 = inlined_call_operand.vmem [shape: f32[2,2,16,1], index: 2, kind: input, shape index: {}]   ;;  %s967_s3 = inlined_call_operand.hbm [shape: f32[2,2,16,32], index: 3, kind: output, shape index: {}]  }
   0x1   :  { %10 = vsyncpa [#allocation3 + $0x1], 0  ;;  %s804_s12 = smov 0   ;;  %s806_s13 = smov 0  }
   0x2   :  { %s808_s14 = smov 0   ;;  %s810_s15 = smov 0  }
   0x3 LB: > { %s825_s16 = sadd.s32 4294967295, %s775_s15   ;;  %s599_s17 = sadd.s32 4294967294, %s775_s15   ;;  %s775_s15 = sphi %s810_s15, %s973_s15   ;;  %s771_s14 = sphi %s808_s14, %s972_s14   ;;  %s767_s13 = sphi %s806_s13, %s971_s13   ;;  %s763_s12 = sphi %s804_s12, %s970_s12  }
   0x4   : > { %s829_s18 = sadd.s32 1, %s775_s15   ;;  %s96_s19 = sadd.s32 1, %s771_s14 }
   0x5   : > { %s93_s20 = ssub.s32 %s775_s15, %s829_s18  ;;  %p106_p0 = scmp.ne.s32.totalorder %s771_s14, %s767_s13 }
   0x6   : > { %p94_p1 = scmp.eq.s32.totalorder %s93_s20, 0  ;;  %p107_p2 = scmp.eq.s32.totalorder %s825_s16, 1 }
   0x7   : > { %p112_p3 = scmp.ne.s32.totalorder %s767_s13, %s763_s12  ;;  %p113_p4 = scmp.eq.s32.totalorder %s599_s17, 1 }
   0x8   : > { %s840_s21 = scalar_select %p94_p1, %s771_s14, %s96_s19  }
   0x9   : > { %p842_p5 = por %p107_p2, %p106_p0  ;;  %p846_p6 = por %p113_p4, %p112_p3 }
   0xa   : > { %p602_p7 = scmp.ge.s32.totalorder %s775_s15, 1  ;;  %p150_p8 = scmp.lt.s32.totalorder %s775_s15, 3 }
   0xc   : > { %p151_p9 = pnand %p602_p7, %p150_p8 }
   0xd   : > { %p179_p10 = scmp.lt.s32.totalorder (!%p151_p9), %s825_s16, 1  ;;  %s777_s29 = smov (!%p151_p9), 1  }
   0xe   : > { %154 = sbr.rel (%p151_p9) target bundleno = 789 (0x315), region = 32  ;;  %s778_s30 = smov (!%p151_p9), 127  }
   0xf   : > { %s779_s4 = smov (!%p151_p9), 126   ;;  %s176_s19 = sand.u32 (!%p151_p9), 1, %s767_s13  }
  0x10   : > { %s603_s20 = sshll.u32 (!%p151_p9), %s176_s19, 5  ;;  %s781_s8 = smov (!%p151_p9), [#allocation2]  }
  0x11   : > { %s719_s9 = sshll.u32 (!%p151_p9), %s781_s8, 4  ;;  %s720_s9 = int_to_ptr.vmem [resolvable:$false] %s719_s9 }
  0x12   : > { %s721_s10 = scalar_lea.vmem (!%p151_p9), %s720_s9, 1024 }
  0x13   : > { %s854_s24 = scalar_select %p179_p10, %s825_s16, 1  ;;  %v197_v2 = vld [vmem:[%s965_s1] sm:$0xff]  ;;  %vm211_vm0 = vcmask 261120   ;;  %v610_v5 = vld [vmem:[%s965_s1 + $0x10] sm:$0xff]  ;;  %v198_v15 = vld [vmem:[%s965_s1 + $0x8] sm:$0xff]  ;;  %v780_v34 = vmov 0  }
  0x14   : > { %650 = vmatprep.mubr.msk.f32.mxu0 %vm211_vm0, %v197_v2  ;;  %661 = vmatprep.mubr.msk.f32.mxu1 %vm211_vm0, %v610_v5  ;;  %v611_v17 = vld [vmem:[%s965_s1 + $0x18] sm:$0xff] }
  0x15   : > { %s627_s25 = sshll.u32 %s854_s24, 4  ;;  %709 = vset.pattern.permute.xlu1 %v780_v34  ;;  %710 = vset.pattern.permute.xlu0 %v780_v34  ;;  %s628_s26 = sshll.u32 %s854_s24, 5 }
  0x16   : > { %s183_s28 = scalar_lea.vmem %s964_s0, %s627_s25  ;;  %s879_s25 = scalar_lea.vmem [#allocation2], %s603_s20 }
  0x17   : > { %v190_v0 = vld [vmem:[%s183_s28 + $0x8] sm:$0xff]  ;;  %v189_v1 = vld [vmem:[%s183_s28] sm:$0xff]  ;;  %s629_s24 = sshll.u32 %s825_s16, 9  ;;  %s924_s16 = scalar_lea.sflag [#allocation3], %s176_s19 }
  0x18   : > { %195 = vrot.lane.b32.xlu0 %v190_v0, %s777_s29  ;;  %193 = vrot.lane.b32.xlu1 %v189_v1, %s777_s29  ;;  %s914_s6 = scalar_lea.hbm %s967_s3, %s629_s24 }
  0x1c   : > { %319 = vrot.lane.b32.xlu0 %v190_v0, %s777_s29  ;;  %317 = vrot.lane.b32.xlu1 %v189_v1, %s777_s29  ;;  %s188_s29 = scalar_lea.vmem %s966_s2, %s628_s26 }
  0x1d   : > { %v452_v59 = vld [vmem:[%s188_s29] sm:$0xff]  ;;  %v616_v62 = vld [vmem:[%s188_s29 + $0x10] sm:$0xff] }
  0x20   : > { %201 = vrot.lane.b32.xlu0 %v190_v0, %s778_s30  ;;  %326 = vrot.lane.b32.xlu1 %v190_v0, %s779_s4  ;;  %v453_v0 = vld [vmem:[%s188_s29 + $0x8] sm:$0xff] }
  0x8a   : > { %v196_v3 = vpop.permute.xlu0 %195  ;;  %v194_v4 = vpop.permute.xlu1 %193 }
  0x8b   : > { %205 = vrot.lane.b32.xlu0 %v196_v3, %s778_s30 }
  0x8e   : > { %v320_v6 = vpop.permute.xlu0 %319  ;;  %v318_v7 = vpop.permute.xlu1 %317 }
  0x8f   : > { %330 = vrot.lane.b32.xlu1 %v320_v6, %s779_s4  ;;  %203 = vrot.lane.b32.xlu0 %v194_v4, %s778_s30  ;;  %v617_v4 = vld [vmem:[%s188_s29 + $0x18] sm:$0xff] }
  0x92   : > { %v202_v8 = vpop.permute.xlu0 %201  ;;  %v327_v9 = vpop.permute.xlu1 %326 }
  0x93   : > { %199 = vrot.lane.b32.xlu0 %v189_v1, %s778_s30  ;;  %328 = vrot.lane.b32.xlu1 %v318_v7, %s779_s4  ;;  %s525_s30 = sshll.u32 %s879_s25, 4  ;;  %s916_s30 = int_to_ptr.vmem [resolvable:$true] %s525_s30 }
  0x94   : > { %s715_s7 = scalar_lea.vmem %s916_s30, 512  ;;  %p722_p0 = scmp.lt.s32.totalorder %s916_s30, %s720_s9 }
  0x95   : > { %p716_p11 = scmp.ne.s32.totalorder %s916_s30, %s715_s7  ;;  %p723_p1 = scmp.lt.s32.totalorder %s721_s10, %s715_s7 }
  0x97   : > { %324 = vrot.lane.b32.xlu1 %v189_v1, %s779_s4  ;;  %p717_p12 = pnand %p716_p11, %p842_p5  ;;  %p724_p2 = por %p723_p1, %p722_p0 }
  0x99   : > { %p718_p13 = pneg %p717_p12 }
  0x9b   : > { %p725_p3 = pnand %p724_p2, %p718_p13 }
  0xfd   : > { %v206_v10 = vpop.permute.xlu0 %205 }
  0xfe   : > { %642 = vmatprep.subr.mxu0 %v206_v10 }
  0xff   : > { %643 = vmatpush3.msra.mxu0 %v206_v10 }
 0x101   : > { %v204_v11 = vpop.permute.xlu0 %203  ;;  %v331_v12 = vpop.permute.xlu1 %330 }
 0x102   : > { %644 = vmatprep.subr.mxu0 %v204_v11  ;;  %653 = vmatprep.subr.mxu1 %v331_v12 }
 0x103   : > { %645 = vmatpush3.msra.mxu0 %v204_v11  ;;  %654 = vmatpush3.msra.mxu1 %v331_v12 }
 0x104   : > { %646 = vmatprep.subr.mxu0 %v202_v8 }
 0x105   : > { %647 = vmatpush3.msra.mxu0 %v202_v8  ;;  %v200_v13 = vpop.permute.xlu0 %199  ;;  %v329_v14 = vpop.permute.xlu1 %328 }
 0x106   : > { %648 = vmatprep.subr.mxu0 %v200_v13  ;;  %655 = vmatprep.subr.mxu1 %v329_v14 }
 0x107   : > { %649 = vmatpush3.msra.mxu0 %v200_v13  ;;  %656 = vmatpush3.msra.mxu1 %v329_v14 }
 0x108   : > { %651 = vmatmul.mubr.msk.f32.vlgmr.msra.gmra.mxu0 %vm211_vm0, %v198_v15  ;;  %657 = vmatprep.subr.mxu1 %v327_v9 }
 0x109   : > { %658 = vmatpush3.msra.mxu1 %v327_v9  ;;  %v325_v16 = vpop.permute.xlu1 %324 }
 0x10a   : > { %659 = vmatprep.subr.mxu1 %v325_v16 }
 0x10b   : > { %660 = vmatpush3.msra.mxu1 %v325_v16 }
 0x10c   : > { %662 = vmatmul.mubr.msk.f32.vlgmr.msra.gmra.mxu1 %vm211_vm0, %v611_v17 }
 0x1c8   : > { %v652_v18 = vpop.f32.mrf.mxu0 }
 0x1c9   : > { %294 = vst.msk [vmem:[%s879_s25 + $0x8] sm:$0xff] %vm211_vm0, %v652_v18  ;;  %v298_v19 = vsel %vm211_vm0, %v652_v18, 0.0  ;;  %v304_v30 = vmul.f32 %v652_v18, %v652_v18 }
 0x1ca   : > { %v284_v20 = vpop.f32.mrf.mxu0  ;;  %299 = vadd.xlane.f32.xlu1 %v298_v19 }
 0x1cb   : > { %293 = vst.msk [vmem:[%s879_s25] sm:$0xff] %vm211_vm0, %v284_v20  ;;  %v303_v21 = vmul.f32 %v284_v20, %v284_v20  ;;  %v295_v27 = vsel %vm211_vm0, %v284_v20, 0.0  ;;  %v308_v31 = vsel %vm211_vm0, %v304_v30, 0.0 }
 0x1cc   : > { %v663_v22 = vpop.f32.mrf.mxu1 }
 0x1cd   : > { %615 = vst.msk [vmem:[%s879_s25 + $0x18] sm:$0xff] %vm211_vm0, %v663_v22  ;;  %v305_v23 = vsel %vm211_vm0, %v303_v21, 0.0  ;;  %v423_v24 = vsel %vm211_vm0, %v663_v22, 0.0  ;;  %v429_v32 = vmul.f32 %v663_v22, %v663_v22 }
 0x1ce   : > { %306 = vadd.xlane.f32.xlu1 %v305_v23  ;;  %424 = vadd.xlane.f32.xlu0 %v423_v24  ;;  %v408_v25 = vpop.f32.mrf.mxu1 }
 0x1cf   : > { %614 = vst.msk [vmem:[%s879_s25 + $0x10] sm:$0xff] %vm211_vm0, %v408_v25  ;;  %v428_v26 = vmul.f32 %v408_v25, %v408_v25  ;;  %v420_v29 = vsel %vm211_vm0, %v408_v25, 0.0  ;;  %v433_v33 = vsel %vm211_vm0, %v429_v32, 0.0 }
 0x1d0   : > { %v464_v18 = vld [vmem:[%s879_s25 + $0x8] sm:$0xff] }
 0x1d1   : > { %v430_v28 = vsel %vm211_vm0, %v428_v26, 0.0 }
 0x1d2   : > { %296 = vadd.xlane.f32.xlu0 %v295_v27  ;;  %431 = vadd.xlane.f32.xlu1 %v430_v28  ;;  %v463_v8 = vld [vmem:[%s879_s25] sm:$0xff] }
 0x1d4   : > { %v619_v19 = vld [vmem:[%s879_s25 + $0x18] sm:$0xff] }
 0x1d6   : > { %421 = vadd.xlane.f32.xlu0 %v420_v29  ;;  %v618_v9 = vld [vmem:[%s879_s25 + $0x10] sm:$0xff] }
 0x1da   : > { %309 = vadd.xlane.f32.xlu0 %v308_v31 }
 0x1de   : > { %434 = vadd.xlane.f32.xlu0 %v433_v33 }
 0x253   : > { %v300_v35 = vpop.xlane.xlu1 %299 }
 0x257   : > { %v425_v36 = vpop.xlane.xlu0 %424  ;;  %v307_v37 = vpop.xlane.xlu1 %306 }
 0x258   : > { %v427_v43 = vadd.f32 %v425_v36, %v300_v35 }
 0x25a   : > { %v439_v48 = vmul.f32 0.015625, %v427_v43 }
 0x25b   : > { %v297_v38 = vpop.xlane.xlu0 %296  ;;  %v432_v39 = vpop.xlane.xlu1 %431 }
 0x25c   : > { %v436_v41 = vadd.f32 %v432_v39, %v307_v37  ;;  %v443_v53 = vmul.f32 %v439_v48, %v439_v48 }
 0x25e   : > { %v440_v46 = vmul.f32 0.015625, %v436_v41 }
 0x25f   : > { %v422_v40 = vpop.xlane.xlu0 %421 }
 0x260   : > { %v426_v42 = vadd.f32 %v422_v40, %v297_v38 }
 0x262   : > { %v438_v44 = vmul.f32 0.015625, %v426_v42 }
 0x263   : > { %v310_v45 = vpop.xlane.xlu0 %309 }
 0x264   : > { %v442_v47 = vmul.f32 %v438_v44, %v438_v44 }
 0x266   : > { %v444_v49 = vsub.f32 %v440_v46, %v442_v47 }
 0x267   : > { %v435_v50 = vpop.xlane.xlu0 %434 }
 0x268   : > { %v446_v51 = vmax.f32 %v444_v49, 0.0  ;;  %v437_v52 = vadd.f32 %v435_v50, %v310_v45 }
 0x26a   : > { %v448_v54 = vadd.f32 1e-05, %v446_v51  ;;  %v441_v55 = vmul.f32 0.015625, %v437_v52 }
 0x26c   : > { %711 = vrsqrt.f32 %v448_v54  ;;  %v445_v56 = vsub.f32 %v441_v55, %v443_v53 }
 0x26e   : > { %v447_v57 = vmax.f32 %v445_v56, 0.0 }
 0x270   : > { %v449_v58 = vadd.f32 1e-05, %v447_v57 }
 0x272   : > { %713 = vrsqrt.f32 %v449_v58 }
 0x279   : > { %v712_v60 = vpop.eup %711 }
 0x27a   : > { %v454_v61 = vmul.f32 %v712_v60, %v452_v59 }
 0x27c   : > { %v459_v63 = vmul.f32 %v454_v61, %v438_v44  ;;  %467 = vperm.xlu1 %709, %v454_v61  }
 0x27e   : > { %v461_v1 = vsub.f32 %v616_v62, %v459_v63 }
 0x27f   : > { %v714_v2 = vpop.eup %713 }
 0x280   : > { %479 = vperm.xlu1 %709, %v461_v1   ;;  %v455_v3 = vmul.f32 %v714_v2, %v453_v0 }
 0x282   : > { %472 = vperm.xlu0 %710, %v455_v3   ;;  %v460_v5 = vmul.f32 %v455_v3, %v439_v48 }
 0x284   : > { %v462_v6 = vsub.f32 %v617_v4, %v460_v5 }
 0x286   : > { %484 = vperm.xlu1 %709, %v462_v6  }
 0x2f7   : > { %v468_v7 = vpop.permute.xlu1 %467 }
 0x2f8   : > { %v475_v10 = vmul.f32 %v468_v7, %v463_v8  ;;  %v499_v11 = vmul.f32 %v618_v9, %v468_v7 }
 0x2fb   : > { %v480_v12 = vpop.permute.xlu1 %479 }
 0x2fc   : > { %v487_v13 = vadd.f32 %v480_v12, %v475_v10  ;;  %v501_v14 = vadd.f32 %v499_v11, %v480_v12 }
 0x2fd   : > { %v473_v15 = vpop.permute.xlu0 %472 }
 0x2fe   : > { %vm489_vm1 = vcmp.gt.f32.partialorder %v487_v13, 0.0  ;;  %v491_v16 = vmul.f32 0.01, %v487_v13  ;;  %vm503_vm2 = vcmp.gt.f32.partialorder %v501_v14, 0.0  ;;  %v505_v17 = vmul.f32 0.01, %v501_v14 }
 0x2ff   : > { %v476_v22 = vmul.f32 %v473_v15, %v464_v18  ;;  %v500_v23 = vmul.f32 %v619_v19, %v473_v15 }
 0x300   : > { %v493_v20 = vsel %vm489_vm1, %v487_v13, %v491_v16  ;;  %v507_v21 = vsel %vm503_vm2, %v501_v14, %v505_v17 }
 0x301   : > { %495 = vst.msk [vmem:[%s879_s25] sm:$0xff] %vm211_vm0, %v493_v20  ;;  %620 = vst.msk [vmem:[%s879_s25 + $0x10] sm:$0xff] %vm211_vm0, %v507_v21  ;;  %v485_v24 = vpop.permute.xlu1 %484 }
 0x302   : > { %v488_v25 = vadd.f32 %v485_v24, %v476_v22  ;;  %v502_v26 = vadd.f32 %v500_v23, %v485_v24 }
 0x304   : > { %vm490_vm3 = vcmp.gt.f32.partialorder %v488_v25, 0.0  ;;  %v492_v27 = vmul.f32 0.01, %v488_v25  ;;  %vm504_vm4 = vcmp.gt.f32.partialorder %v502_v26, 0.0  ;;  %v506_v28 = vmul.f32 0.01, %v502_v26 }
 0x306   : > { %v494_v29 = vsel %vm490_vm3, %v488_v25, %v492_v27  ;;  %v508_v30 = vsel %vm504_vm4, %v502_v26, %v506_v28 }
 0x307   : > { %496 = vst.msk [vmem:[%s879_s25 + $0x8] sm:$0xff] %vm211_vm0, %v494_v29  ;;  %621 = vst.msk [vmem:[%s879_s25 + $0x18] sm:$0xff] %vm211_vm0, %v508_v30 }
 0x308   : > { %728 = shalt.err (!%p725_p3)
}
 0x309   : > { %s729_s11 = scalar_lea.hbm %s914_s6, 512  ;;  %s733_s20 = scalar_lea.hbm %s967_s3, 1024 }
 0x30a   : > { %p730_p4 = scmp.ne.s32.totalorder %s914_s6, %s729_s11  ;;  %p734_p9 = scmp.lt.s32.totalorder %s914_s6, %s967_s3 }
 0x30b   : > { %p735_p10 = scmp.lt.s32.totalorder %s733_s20, %s729_s11 }
 0x30c   : > { %p731_p7 = pnand %p730_p4, %p842_p5 }
 0x30d   : > { %p736_p11 = por %p735_p10, %p734_p9 }
 0x30e   : > { %p732_p8 = pneg %p731_p7 }
 0x310   : > { %p737_p12 = pnand %p736_p11, %p732_p8 }
 0x312   : > { %740 = shalt.err (!%p737_p12)
}
 0x313   : > { %s782_s27 = smov 128   ;;  %s783_s28 = smov 8  }
 0x314   : > { %664 = dma.vmem_to_hbm [thread:$0]  (%p842_p5), %s916_s30, 512, %s914_s6, %s924_s16, %s782_s27, %s782_s27, %s783_s28  }
 0x315 PF: > { %p670_p13 = scmp.ge.s32.totalorder %s775_s15, 2  ;;  %s540_s29 = sand.u32 1, %s763_s12  }
 0x316   : > { %s541_s24 = scalar_lea.sflag [#allocation3], %s540_s29 }
 0x317   : > { %p667_p0 = pnand %p670_p13, %p846_p6 }
 0x319   : > { %p668_p1 = pneg %p667_p0 }
 0x31b   : > { %758 = dma.done.wait (%p668_p1), %s541_s24, 512  }
 0x31c   : > { %760 = vsyncadd (%p668_p1), %s541_s24, 4294966784  ;;  %p13_p2 = scmp.ge.s32.totalorder %s829_s18, 4   ;;  %s970_s12 = smov %s767_s13 }
 0x31d   : > { %s971_s13 = smov %s771_s14  ;;  %s972_s14 = smov %s840_s21 }
 0x31e   : > { %s973_s15 = smov %s829_s18  ;;  %15 = sbr.rel (!%p13_p2) target bundleno = 3 (0x3), region = 73 }
 0x323   :  { %546 = vsyncpa [#allocation3], 1 }
 0x324   :  { %548 = vsyncpa [#allocation3 + $0x1], 1 }

</bundles_post_ra>
